<compile_context>
chip_gen: v6e
topology: v6e:2x2x1
jax: 0.10.0
libtpu: 0.0.40
codegen_flags: <defaults>
</compile_context>

<pallas_src>
import jax
import jax.numpy as jnp
import numpy as np
from jax.experimental import pallas as pl
from jax.experimental.pallas import tpu as pltpu


def _round_up(x, m):
    return (x + m - 1) // m * m


def clip_zero_shot_kernel(x_ref, w_ref, txt_ref, o_ref, acc_ref):
    # x_ref:   [tb, tk]   bf16 flattened-pixel tile
    # w_ref:   [tk, D]    bf16 synthetic encoder weight tile (streamed over K)
    # txt_ref: [D,  Cp]   f32 zero-shot text embeddings (VMEM-resident)
    # o_ref:   [tb, Cp]   f32 logits tile
    # acc_ref: [tb, D]    f32 accumulator (persists across the K grid axis)
    k = pl.program_id(1)

    @pl.when(k == 0)
    def _():
        acc_ref[...] = jnp.zeros_like(acc_ref)

    # encode_image (synthetic linear): partial [tb,tk]@[tk,D], f32 accumulate (MXU).
    acc_ref[...] += jnp.dot(x_ref[...], w_ref[...],
                            preferred_element_type=jnp.float32)

    @pl.when(k == pl.num_programs(1) - 1)
    def _():
        feats = acc_ref[...]                                  # [tb, D] f32
        # Row L2 norm; normalization folded into the much smaller logits tile.
        sq = jnp.sum(feats * feats, axis=-1, keepdims=True)   # [tb, 1]
        inv_norm = jax.lax.rsqrt(sq)                          # EUP slot
        logits = jnp.dot(feats, txt_ref[...],
                         preferred_element_type=jnp.float32)  # [tb, Cp]
        o_ref[...] = logits * inv_norm


def clip_zero_shot_forward(x_nchw, w_enc, txt_feas, *, tb_max=128, tk_max=2048):
    """img_features = normalize(x @ W_enc); out = img_features @ txt_feas."""
    B = x_nchw.shape[0]
    P = int(np.prod(x_nchw.shape[1:]))
    D, C = txt_feas.shape
    assert w_enc.shape == (P, D)
    assert D % 128 == 0, "backbone_out_size must be lane-aligned"

    # ---- padded / tiled geometry -------------------------------------------
    B_pad = _round_up(B, 8)
    tb = min(tb_max, B_pad)
    B_pad = _round_up(B_pad, tb)

    C_pad = _round_up(C, 128)            # lane-dense output (no masked stores)

    if P <= tk_max:                      # single K step for small inputs
        tk = _round_up(P, 128)
        P_pad = tk
    else:                                # stream weight over K
        tk = tk_max
        P_pad = _round_up(P, tk)

    nb, nk = B_pad // tb, P_pad // tk

    # ---- host-side padding / dtype staging ---------------------------------
    # bf16 on the streamed operands halves HBM traffic; accumulate stays f32.
    x_flat = jnp.zeros((B_pad, P_pad), jnp.bfloat16)
    x_flat = x_flat.at[:B, :P].set(x_nchw.reshape(B, P).astype(jnp.bfloat16))

    w_pad = jnp.zeros((P_pad, D), jnp.bfloat16)
    w_pad = w_pad.at[:P, :].set(w_enc.astype(jnp.bfloat16))

    txt_pad = jnp.zeros((D, C_pad), jnp.float32)
    txt_pad = txt_pad.at[:, :C].set(txt_feas.astype(jnp.float32))

    cost = pl.CostEstimate(
        flops=2 * B_pad * P_pad * D + 2 * B_pad * D * C_pad,
        transcendentals=B_pad,
        bytes_accessed=(x_flat.size * 2 + w_pad.size * 2
                        + txt_pad.size * 4 + B_pad * C_pad * 4),
    )

    out = pl.pallas_call(
        clip_zero_shot_kernel,
        out_shape=jax.ShapeDtypeStruct((B_pad, C_pad), jnp.float32),
        grid_spec=pltpu.PrefetchScalarGridSpec(
            num_scalar_prefetch=0,
            grid=(nb, nk),
            in_specs=[
                pl.BlockSpec((tb, tk), lambda i, k: (i, k)),     # pixels tile
                pl.BlockSpec((tk, D), lambda i, k: (k, 0)),      # weight tile
                pl.BlockSpec((D, C_pad), lambda i, k: (0, 0)),   # txt: resident
            ],
            out_specs=pl.BlockSpec((tb, C_pad), lambda i, k: (i, 0)),
            scratch_shapes=[pltpu.VMEM((tb, D), jnp.float32)],
        ),
        compiler_params=pltpu.CompilerParams(
            dimension_semantics=("parallel", "arbitrary"),
            vmem_limit_bytes=48 * 1024 * 1024,   # safe under v7x's 64 MiB VMEM
        ),
        cost_estimate=cost,
    )(x_flat, w_pad, txt_pad)

    return out[:B, :C]


def build_txt_feas(key, num_classes, num_templates, dim):
    """Deterministic stand-in for txt_features(): per-class mean of unit-norm
    template embeddings, re-normalized, stacked along dim=1 -> [dim, classes]."""
    emb = jax.random.normal(key, (num_classes, num_templates, dim), jnp.float32)
    emb = emb / jnp.linalg.norm(emb, axis=-1, keepdims=True)
    cls = emb.mean(axis=1)
    cls = cls / jnp.linalg.norm(cls, axis=-1, keepdims=True)
    return cls.T                                              # [dim, C]


if __name__ == "__main__":
    # Small, deterministic shapes consistent with the module's forward.
    B, Cin, H, W = 2, 4, 16, 16          # image batch (NCHW)
    D = 512                               # backbone_out_size
    NUM_CLASSES = 8
    NUM_TEMPLATES = 4
    P = Cin * H * W                       # 1024

    key = jax.random.PRNGKey(0)
    k_x, k_enc, k_txt = jax.random.split(key, 3)

    x = jax.random.normal(k_x, (B, Cin, H, W), jnp.float32)
    w_enc = jax.random.normal(k_enc, (P, D), jnp.float32) / np.sqrt(P)
    txt_feas = build_txt_feas(k_txt, NUM_CLASSES, NUM_TEMPLATES, D)

    out = jax.block_until_ready(clip_zero_shot_forward(x, w_enc, txt_feas))

    # Pure-JAX reference (same bf16 rounding of the streamed operands as the
    # kernel's MXU path; f32 accumulation).
    xb = x.reshape(B, P).astype(jnp.bfloat16).astype(jnp.float32)
    wb = w_enc.astype(jnp.bfloat16).astype(jnp.float32)
    feats_ref = jnp.dot(xb, wb, precision=jax.lax.Precision.HIGHEST)
    feats_ref = feats_ref / jnp.linalg.norm(feats_ref, axis=-1, keepdims=True)
    ref = jnp.dot(feats_ref, txt_feas, precision=jax.lax.Precision.HIGHEST)

    np.testing.assert_allclose(np.asarray(out), np.asarray(ref),
                               rtol=2e-3, atol=2e-3)
    assert out.shape == (B, NUM_CLASSES)

    print("KERNEL_OK")
</pallas_src>

<mosaic_0001>
module attributes {stable_mosaic.version = 11 : i64} {
  func.func @clip_zero_shot_kernel(%arg0: i32, %arg1: i32, %arg2: memref<8x1024xbf16, #tpu.memory_space<vmem>>, %arg3: memref<1024x512xbf16, #tpu.memory_space<vmem>>, %arg4: memref<512x128xf32, #tpu.memory_space<vmem>>, %arg5: memref<8x128xf32, #tpu.memory_space<vmem>>, %arg6: memref<8x512xf32, #tpu.memory_space<vmem>>) attributes {dimension_semantics = [#tpu.dimension_semantics<parallel>, #tpu.dimension_semantics<arbitrary>], iteration_bounds = array<i64: 1, 1>, scalar_prefetch = 0 : i64, scratch_operands = 1 : i64, tpu.core_type = #tpu.core_type<tc>, window_params = [{transform_indices = @transform_0, window_bounds = array<i64: 8, 1024>}, {transform_indices = @transform_1, window_bounds = array<i64: 1024, 512>}, {pipeline_mode = #tpu.pipeline_mode<synchronous>, transform_indices = @transform_2, window_bounds = array<i64: 512, 128>}, {transform_indices = @transform_3, window_bounds = array<i64: 8, 128>}]} {
    %c0_i32 = arith.constant 0 : i32
    %0 = arith.cmpi eq, %arg1, %c0_i32 : i32
    %1 = arith.extui %0 : i1 to i32
    %c0_i32_0 = arith.constant 0 : i32
    %2 = arith.cmpi ne, %1, %c0_i32_0 : i32
    scf.if %2 {
      %cst_10 = arith.constant 0.000000e+00 : f32
      %12 = vector.broadcast %cst_10 : f32 to vector<8x512xf32>
      %c0_11 = arith.constant 0 : index
      %c0_12 = arith.constant 0 : index
      %13 = vector.load %arg6[%c0_11, %c0_12] : memref<8x512xf32, #tpu.memory_space<vmem>>, vector<8x512xf32>
      tpu.vector_store %arg6[%c0_11, %c0_12], %12 {strides = array<i32>} : memref<8x512xf32, #tpu.memory_space<vmem>>, vector<8x512xf32>,
    } else {
    }
    %c0 = arith.constant 0 : index
    %c0_1 = arith.constant 0 : index
    %3 = vector.load %arg6[%c0, %c0_1] : memref<8x512xf32, #tpu.memory_space<vmem>>, vector<8x512xf32>
    %c0_2 = arith.constant 0 : index
    %c0_3 = arith.constant 0 : index
    %4 = vector.load %arg2[%c0_2, %c0_3] : memref<8x1024xbf16, #tpu.memory_space<vmem>>, vector<8x1024xbf16>
    %c0_4 = arith.constant 0 : index
    %c0_5 = arith.constant 0 : index
    %5 = vector.load %arg3[%c0_4, %c0_5] : memref<1024x512xbf16, #tpu.memory_space<vmem>>, vector<1024x512xbf16>
    %cst = arith.constant dense<0.000000e+00> : vector<8x512xf32>
    %6 = tpu.matmul %4, %5, %cst {dimension_numbers = #tpu.dot_dimension_numbers<[1], [0], [0], [1], [0, 0, 1, 1], [], []>} : vector<8x1024xbf16>, vector<1024x512xbf16>, vector<8x512xf32> -> vector<8x512xf32>
    %7 = arith.addf %3, %6 : vector<8x512xf32>
    %c0_6 = arith.constant 0 : index
    %c0_7 = arith.constant 0 : index
    %8 = vector.load %arg6[%c0_6, %c0_7] : memref<8x512xf32, #tpu.memory_space<vmem>>, vector<8x512xf32>
    tpu.vector_store %arg6[%c0_6, %c0_7], %7 {strides = array<i32>} : memref<8x512xf32, #tpu.memory_space<vmem>>, vector<8x512xf32>,
    %c0_i32_8 = arith.constant 0 : i32
    %9 = arith.cmpi eq, %arg1, %c0_i32_8 : i32
    %10 = arith.extui %9 : i1 to i32
    %c0_i32_9 = arith.constant 0 : i32
    %11 = arith.cmpi ne, %10, %c0_i32_9 : i32
    scf.if %11 {
      %c0_10 = arith.constant 0 : index
      %c0_11 = arith.constant 0 : index
      %12 = vector.load %arg6[%c0_10, %c0_11] : memref<8x512xf32, #tpu.memory_space<vmem>>, vector<8x512xf32>
      %13 = arith.mulf %12, %12 : vector<8x512xf32>
      %cst_12 = arith.constant dense<0.000000e+00> : vector<8xf32>
      %14 = vector.multi_reduction <add>, %13, %cst_12 [1] : vector<8x512xf32> to vector<8xf32>
      %15 = vector.shape_cast %14 : vector<8xf32> to vector<8x1xf32>
      %16 = math.rsqrt %15 : vector<8x1xf32>
      %c0_13 = arith.constant 0 : index
      %c0_14 = arith.constant 0 : index
      %17 = vector.load %arg4[%c0_13, %c0_14] : memref<512x128xf32, #tpu.memory_space<vmem>>, vector<512x128xf32>
      %cst_15 = arith.constant dense<0.000000e+00> : vector<8x128xf32>
      %18 = tpu.matmul %12, %17, %cst_15 {dimension_numbers = #tpu.dot_dimension_numbers<[1], [0], [0], [1], [0, 0, 1, 1], [], []>} : vector<8x512xf32>, vector<512x128xf32>, vector<8x128xf32> -> vector<8x128xf32>
      %19 = vector.broadcast %16 : vector<8x1xf32> to vector<8x128xf32>
      %20 = arith.mulf %18, %19 : vector<8x128xf32>
      %c0_16 = arith.constant 0 : index
      %c0_17 = arith.constant 0 : index
      %21 = vector.load %arg5[%c0_16, %c0_17] : memref<8x128xf32, #tpu.memory_space<vmem>>, vector<8x128xf32>
      tpu.vector_store %arg5[%c0_16, %c0_17], %20 {strides = array<i32>} : memref<8x128xf32, #tpu.memory_space<vmem>>, vector<8x128xf32>,
    } else {
    }
    return
  }
  func.func @transform_0(%arg0: i32, %arg1: i32) -> (i32, i32) {
    %c0_i32 = arith.constant 0 : i32
    return %arg0, %arg1 : i32, i32
  }
  func.func @transform_1(%arg0: i32, %arg1: i32) -> (i32, i32) {
    %c0_i32 = arith.constant 0 : i32
    %c0_i32_0 = arith.constant 0 : i32
    return %arg1, %c0_i32 : i32, i32
  }
  func.func @transform_2(%arg0: i32, %arg1: i32) -> (i32, i32) {
    %c0_i32 = arith.constant 0 : i32
    %c0_i32_0 = arith.constant 0 : i32
    %c0_i32_1 = arith.constant 0 : i32
    return %c0_i32, %c0_i32_0 : i32, i32
  }
  func.func @transform_3(%arg0: i32, %arg1: i32) -> (i32, i32) {
    %c0_i32 = arith.constant 0 : i32
    %c0_i32_0 = arith.constant 0 : i32
    return %arg0, %c0_i32 : i32, i32
  }
}

</mosaic_0001>

<bundles_post_ra>
// kernel: tpu_custom_call.1
= control target key start
LH: loop header
LB: loop body
LE: loop exit
PB: predicated region body
PF: predicated region fallthrough
CT: control target
= control target key end

     0   :  { %8 = vsyncpa [#allocation4], 0  ;;  %s3124_s0 = inlined_call_operand.hbm [shape: bf16[8,1024], index: 0, kind: input, shape index: {}]   ;;  %s3125_s1 = inlined_call_operand.hbm [shape: bf16[1024,512], index: 1, kind: input, shape index: {}]   ;;  %s3126_s2 = inlined_call_operand.hbm [shape: f32[512,128], index: 2, kind: input, shape index: {}]   ;;  %s3127_s3 = inlined_call_operand.hbm [shape: f32[8,128], index: 3, kind: output, shape index: {}]  }
   0x1   :  { %9 = vsyncpa [#allocation7], 0 }
   0x2   :  { %10 = vsyncpa [#allocation5], 0  ;;  %s3031_s12 = smov [#allocation6]  }
   0x3   :  { %s26_s13 = sshll.u32 %s3031_s12, 4  ;;  %s27_s13 = int_to_ptr.vmem [resolvable:$true] %s26_s13 }
   0x4   :  { %s2953_s14 = scalar_lea.vmem %s27_s13, 32768  ;;  %p2958_p1 = scmp.lt.s32.totalorder %s27_s13, %s27_s13 }
   0x5   :  { %p2954_p0 = scmp.ne.s32.totalorder %s27_s13, %s2953_s14  ;;  %p2959_p2 = scmp.lt.s32.totalorder %s2953_s14, %s2953_s14 }
   0x7   :  { %p2960_p3 = por %p2959_p2, %p2958_p1 }
   0x9   :  { %p2961_p4 = pnand %p2960_p3, %p2954_p0 }
   0xb   :  { %2964 = shalt.err (!%p2961_p4)
}
   0xc   :  { %s3032_s15 = smov 256   ;;  %s3033_s16 = smov 16  }
   0xd   :  { %32 = dma.hbm_to_vmem [thread:$0]  %s3125_s1, 32768, %s27_s13, [#allocation7], %s3032_s15, %s3032_s15, %s3033_s16  }
   0xe   :  { %s3034_s19 = smov [#allocation3]   ;;  %s3035_s21 = smov [#allocation8]  }
   0xf   :  { %s17_s20 = sshll.u32 %s3034_s19, 4  ;;  %s38_s22 = sshll.u32 %s3035_s21, 4  ;;  %s18_s20 = int_to_ptr.vmem [resolvable:$true] %s17_s20  ;;  %s39_s22 = int_to_ptr.vmem [resolvable:$true] %s38_s22 }
  0x10   :  { %s2973_s23 = scalar_lea.vmem %s18_s20, 512  ;;  %p2978_p6 = scmp.lt.s32.totalorder %s18_s20, %s18_s20 }
  0x11   :  { %p2974_p5 = scmp.ne.s32.totalorder %s18_s20, %s2973_s23  ;;  %p2979_p7 = scmp.lt.s32.totalorder %s2973_s23, %s2973_s23 }
  0x13   :  { %p2980_p8 = por %p2979_p7, %p2978_p6 }
  0x15   :  { %p2981_p9 = pnand %p2980_p8, %p2974_p5 }
  0x17   :  { %2984 = shalt.err (!%p2981_p9)
}
  0x18   :  { %20 = dma.hbm_to_vmem [thread:$0]  %s3124_s0, 512, %s18_s20, [#allocation4]  }
  0x19   :  { %s2993_s26 = scalar_lea.vmem %s39_s22, 8192  ;;  %p2998_p11 = scmp.lt.s32.totalorder %s39_s22, %s39_s22 }
  0x1a   :  { %p2994_p10 = scmp.ne.s32.totalorder %s39_s22, %s2993_s26  ;;  %p2999_p12 = scmp.lt.s32.totalorder %s2993_s26, %s2993_s26 }
  0x1c   :  { %p3000_p13 = por %p2999_p12, %p2998_p11 }
  0x1e   :  { %p3001_p0 = pnand %p3000_p13, %p2994_p10 }
  0x20   :  { %3004 = shalt.err (!%p3001_p0)
}
  0x21   :  { %s3036_s1 = smov 128   ;;  %s3037_s27 = smov 8  }
  0x22   :  { %44 = dma.hbm_to_vmem [thread:$0]  %s3126_s2, 8192, %s39_s22, [#allocation7], %s3036_s1, %s3036_s1, %s3037_s27  }
  0x23   :  { %3025 = dma.done.wait [#allocation4], 512  }
  0x24   :  { %3026 = vsyncadd [#allocation4], 4294966784 }
  0x25   :  { %3027 = dma.done.wait [#allocation7], 40960  }
  0x26   :  { %3028 = vsyncadd [#allocation7], 4294926336  ;;  %v2551_v0 = vld [vmem:[#allocation6 + $0xe4] ss:$16 sps:$4 sm:$0xff]   ;;  %v2555_v2 = vld [vmem:[#allocation6 + $0xe0] ss:$16 sps:$4 sm:$0xff]  }
  0x27   :  { %v2553_v1 = vld [vmem:[#allocation6 + $0x2e4] ss:$16 sps:$4 sm:$0xff]   ;;  %1634 = vmatprep.subr.bf16.mxu0 %v2551_v0  ;;  %v2556_v3 = vld [vmem:[#allocation6 + $0x2e0] ss:$16 sps:$4 sm:$0xff]   ;;  %v67_v48 = vld [vmem:[#allocation3 + $0x8] sm:$0xff]  ;;  %s3038_s0 = smov [#allocation9]  }
  0x28   :  { %1675 = vmatprep.subr.bf16.mxu1 %v2553_v1  ;;  %v2557_v4 = vld [vmem:[#allocation6 + $0xc4] ss:$16 sps:$4 sm:$0xff]   ;;  %1635 = vmatpush1.bf16.msra.mxu0 %v2555_v2  ;;  %v2561_v6 = vld [vmem:[#allocation6 + $0xc0] ss:$16 sps:$4 sm:$0xff]   ;;  %v3070_v51 = vcombine.high %v67_v48, %v67_v48  ;;  %s2199_s2 = sshll.u32 %s3038_s0, 4  ;;  %s2200_s2 = int_to_ptr.vmem [resolvable:$true] %s2199_s2 }
  0x29   :  { %1676 = vmatpush1.bf16.msra.mxu1 %v2556_v3  ;;  %v2559_v5 = vld [vmem:[#allocation6 + $0x2c4] ss:$16 sps:$4 sm:$0xff]   ;;  %1636 = vmatprep.subr.bf16.mxu0 %v2557_v4  ;;  %v2562_v7 = vld [vmem:[#allocation6 + $0x2c0] ss:$16 sps:$4 sm:$0xff]   ;;  %s3005_s30 = scalar_lea.vmem %s2200_s2, 128  ;;  %p3010_p2 = scmp.lt.s32.totalorder %s2200_s2, %s2200_s2 }
  0x2a   :  { %1677 = vmatprep.subr.bf16.mxu1 %v2559_v5  ;;  %v2563_v8 = vld [vmem:[#allocation6 + $0xa4] ss:$16 sps:$4 sm:$0xff]   ;;  %v2567_v10 = vld [vmem:[#allocation6 + $0xa0] ss:$16 sps:$4 sm:$0xff]   ;;  %1707 = vmatprep.mubr.bf16.mxu1 %v3070_v51  ;;  %p3006_p1 = scmp.ne.s32.totalorder %s2200_s2, %s3005_s30  ;;  %p3011_p3 = scmp.lt.s32.totalorder %s3005_s30, %s3005_s30 }
  0x2b   :  { %v2565_v9 = vld [vmem:[#allocation6 + $0x2a4] ss:$16 sps:$4 sm:$0xff]   ;;  %v2568_v11 = vld [vmem:[#allocation6 + $0x2a0] ss:$16 sps:$4 sm:$0xff]  }
  0x2c   :  { %1637 = vmatpush1.bf16.msra.mxu0 %v2561_v6  ;;  %v2569_v12 = vld [vmem:[#allocation6 + $0x84] ss:$16 sps:$4 sm:$0xff]   ;;  %v2573_v14 = vld [vmem:[#allocation6 + $0x80] ss:$16 sps:$4 sm:$0xff]   ;;  %p3012_p4 = por %p3011_p3, %p3010_p2 }
  0x2d   :  { %1678 = vmatpush1.bf16.msra.mxu1 %v2562_v7  ;;  %1638 = vmatprep.subr.bf16.mxu0 %v2563_v8  ;;  %v2571_v13 = vld [vmem:[#allocation6 + $0x284] ss:$16 sps:$4 sm:$0xff]   ;;  %v2574_v15 = vld [vmem:[#allocation6 + $0x280] ss:$16 sps:$4 sm:$0xff]   ;;  %v3076_v7 = vcombine.low %v67_v48, %v67_v48 }
  0x2e   :  { %1679 = vmatprep.subr.bf16.mxu1 %v2565_v9  ;;  %v2575_v16 = vld [vmem:[#allocation6 + $0x64] ss:$16 sps:$4 sm:$0xff]   ;;  %v2579_v18 = vld [vmem:[#allocation6 + $0x60] ss:$16 sps:$4 sm:$0xff]   ;;  %p3013_p5 = pnand %p3012_p4, %p3006_p1 }
  0x2f   :  { %v2577_v17 = vld [vmem:[#allocation6 + $0x264] ss:$16 sps:$4 sm:$0xff]   ;;  %v2580_v19 = vld [vmem:[#allocation6 + $0x260] ss:$16 sps:$4 sm:$0xff]  }
  0x30   :  { %1639 = vmatpush1.bf16.msra.mxu0 %v2567_v10  ;;  %v2581_v20 = vld [vmem:[#allocation6 + $0x44] ss:$16 sps:$4 sm:$0xff]   ;;  %v2585_v22 = vld [vmem:[#allocation6 + $0x40] ss:$16 sps:$4 sm:$0xff]  }
  0x31   :  { %1680 = vmatpush1.bf16.msra.mxu1 %v2568_v11  ;;  %1640 = vmatprep.subr.bf16.mxu0 %v2569_v12  ;;  %v2583_v21 = vld [vmem:[#allocation6 + $0x244] ss:$16 sps:$4 sm:$0xff]   ;;  %v2586_v23 = vld [vmem:[#allocation6 + $0x240] ss:$16 sps:$4 sm:$0xff]  }
  0x32   :  { %1681 = vmatprep.subr.bf16.mxu1 %v2571_v13  ;;  %v2587_v24 = vld [vmem:[#allocation6 + $0x24] ss:$16 sps:$4 sm:$0xff]   ;;  %v2591_v26 = vld [vmem:[#allocation6 + $0x20] ss:$16 sps:$4 sm:$0xff]  }
  0x33   :  { %v2589_v25 = vld [vmem:[#allocation6 + $0x224] ss:$16 sps:$4 sm:$0xff]   ;;  %v2592_v27 = vld [vmem:[#allocation6 + $0x220] ss:$16 sps:$4 sm:$0xff]  }
  0x34   :  { %1641 = vmatpush1.bf16.msra.mxu0 %v2573_v14  ;;  %v2593_v28 = vld [vmem:[#allocation6 + $0x4] ss:$16 sps:$4 sm:$0xff]   ;;  %v2597_v30 = vld [vmem:[#allocation6] ss:$16 sps:$4 sm:$0xff]  }
  0x35   :  { %1682 = vmatpush1.bf16.msra.mxu1 %v2574_v15  ;;  %1642 = vmatprep.subr.bf16.mxu0 %v2575_v16  ;;  %v2595_v29 = vld [vmem:[#allocation6 + $0x204] ss:$16 sps:$4 sm:$0xff]   ;;  %v2598_v31 = vld [vmem:[#allocation6 + $0x200] ss:$16 sps:$4 sm:$0xff]  }
  0x36   :  { %1683 = vmatprep.subr.bf16.mxu1 %v2577_v17  ;;  %v2599_v32 = vld [vmem:[#allocation6 + $0x1e4] ss:$16 sps:$4 sm:$0xff]   ;;  %v2603_v34 = vld [vmem:[#allocation6 + $0x1e0] ss:$16 sps:$4 sm:$0xff]  }
  0x37   :  { %v2601_v33 = vld [vmem:[#allocation6 + $0x3e4] ss:$16 sps:$4 sm:$0xff]   ;;  %v2604_v35 = vld [vmem:[#allocation6 + $0x3e0] ss:$16 sps:$4 sm:$0xff]  }
  0x38   :  { %1643 = vmatpush1.bf16.msra.mxu0 %v2579_v18  ;;  %v2605_v36 = vld [vmem:[#allocation6 + $0x1c4] ss:$16 sps:$4 sm:$0xff]   ;;  %v2609_v38 = vld [vmem:[#allocation6 + $0x1c0] ss:$16 sps:$4 sm:$0xff]  }
  0x39   :  { %1684 = vmatpush1.bf16.msra.mxu1 %v2580_v19  ;;  %1644 = vmatprep.subr.bf16.mxu0 %v2581_v20  ;;  %v2607_v37 = vld [vmem:[#allocation6 + $0x3c4] ss:$16 sps:$4 sm:$0xff]   ;;  %v2610_v39 = vld [vmem:[#allocation6 + $0x3c0] ss:$16 sps:$4 sm:$0xff]  }
  0x3a   :  { %1685 = vmatprep.subr.bf16.mxu1 %v2583_v21  ;;  %v2611_v40 = vld [vmem:[#allocation6 + $0x1a4] ss:$16 sps:$4 sm:$0xff]   ;;  %v2615_v42 = vld [vmem:[#allocation6 + $0x1a0] ss:$16 sps:$4 sm:$0xff]  }
  0x3b   :  { %v2613_v41 = vld [vmem:[#allocation6 + $0x3a4] ss:$16 sps:$4 sm:$0xff]   ;;  %v2616_v43 = vld [vmem:[#allocation6 + $0x3a0] ss:$16 sps:$4 sm:$0xff]  }
  0x3c   :  { %1645 = vmatpush1.bf16.msra.mxu0 %v2585_v22  ;;  %v2617_v44 = vld [vmem:[#allocation6 + $0x184] ss:$16 sps:$4 sm:$0xff]   ;;  %v2621_v49 = vld [vmem:[#allocation6 + $0x180] ss:$16 sps:$4 sm:$0xff]  }
  0x3d   :  { %1686 = vmatpush1.bf16.msra.mxu1 %v2586_v23  ;;  %1646 = vmatprep.subr.bf16.mxu0 %v2587_v24  ;;  %v2619_v45 = vld [vmem:[#allocation6 + $0x384] ss:$16 sps:$4 sm:$0xff]   ;;  %v2622_v50 = vld [vmem:[#allocation6 + $0x380] ss:$16 sps:$4 sm:$0xff]  }
  0x3e   :  { %1687 = vmatprep.subr.bf16.mxu1 %v2589_v25  ;;  %v66_v46 = vld [vmem:[#allocation3] sm:$0xff] }
  0x3f   :  { %v3068_v47 = vcombine.high %v66_v46, %v66_v46  ;;  %v2623_v52 = vld [vmem:[#allocation6 + $0x164] ss:$16 sps:$4 sm:$0xff]   ;;  %v2627_v54 = vld [vmem:[#allocation6 + $0x160] ss:$16 sps:$4 sm:$0xff]   ;;  %v3074_v6 = vcombine.low %v66_v46, %v66_v46 }
  0x40   :  { %1647 = vmatpush1.bf16.msra.mxu0 %v2591_v26  ;;  %v2625_v53 = vld [vmem:[#allocation6 + $0x364] ss:$16 sps:$4 sm:$0xff]   ;;  %v2628_v55 = vld [vmem:[#allocation6 + $0x360] ss:$16 sps:$4 sm:$0xff]  }
  0x41   :  { %1688 = vmatpush1.bf16.msra.mxu1 %v2592_v27  ;;  %1648 = vmatprep.subr.bf16.mxu0 %v2593_v28  ;;  %v2629_v56 = vld [vmem:[#allocation6 + $0x144] ss:$16 sps:$4 sm:$0xff]   ;;  %v2633_v58 = vld [vmem:[#allocation6 + $0x140] ss:$16 sps:$4 sm:$0xff]  }
  0x42   :  { %1689 = vmatprep.subr.bf16.mxu1 %v2595_v29  ;;  %1666 = vmatprep.mubr.bf16.mxu0 %v3068_v47  ;;  %v2631_v57 = vld [vmem:[#allocation6 + $0x344] ss:$16 sps:$4 sm:$0xff]   ;;  %v2634_v59 = vld [vmem:[#allocation6 + $0x340] ss:$16 sps:$4 sm:$0xff]  }
  0x43   :  { %v2635_v60 = vld [vmem:[#allocation6 + $0x124] ss:$16 sps:$4 sm:$0xff]   ;;  %v2639_v62 = vld [vmem:[#allocation6 + $0x120] ss:$16 sps:$4 sm:$0xff]  }
  0x44   :  { %1649 = vmatpush1.bf16.msra.mxu0 %v2597_v30  ;;  %v2637_v61 = vld [vmem:[#allocation6 + $0x324] ss:$16 sps:$4 sm:$0xff]   ;;  %v2640_v63 = vld [vmem:[#allocation6 + $0x320] ss:$16 sps:$4 sm:$0xff]  }
  0x45   :  { %1690 = vmatpush1.bf16.msra.mxu1 %v2598_v31  ;;  %1650 = vmatprep.subr.bf16.mxu0 %v2599_v32  ;;  %v2641_v0 = vld [vmem:[#allocation6 + $0x104] ss:$16 sps:$4 sm:$0xff]   ;;  %v2645_v2 = vld [vmem:[#allocation6 + $0x100] ss:$16 sps:$4 sm:$0xff]  }
  0x46   :  { %1691 = vmatprep.subr.bf16.mxu1 %v2601_v33  ;;  %v2643_v1 = vld [vmem:[#allocation6 + $0x304] ss:$16 sps:$4 sm:$0xff]   ;;  %v2646_v3 = vld [vmem:[#allocation6 + $0x300] ss:$16 sps:$4 sm:$0xff]   ;;  %v3082_v33 = vld [vmem:[#allocation3 + $0x18] sm:$0xff] }
  0x47   :  { %v2653_v4 = vld [vmem:[#allocation6 + $0x4e4] ss:$16 sps:$4 sm:$0xff]   ;;  %v2651_v8 = vld [vmem:[#allocation6 + $0x4e0] ss:$16 sps:$4 sm:$0xff]  }
  0x48   :  { %1651 = vmatpush2.bf16.msra.mxu0 %v2603_v34  ;;  %v2656_v5 = vld [vmem:[#allocation6 + $0x6e4] ss:$16 sps:$4 sm:$0xff]   ;;  %v2654_v9 = vld [vmem:[#allocation6 + $0x6e0] ss:$16 sps:$4 sm:$0xff]  }
  0x49   :  { %1692 = vmatpush2.bf16.msra.mxu1 %v2604_v35  ;;  %1652 = vmatprep.subr.bf16.mxu0 %v2605_v36  ;;  %v2659_v10 = vld [vmem:[#allocation6 + $0x4c4] ss:$16 sps:$4 sm:$0xff]   ;;  %v2657_v12 = vld [vmem:[#allocation6 + $0x4c0] ss:$16 sps:$4 sm:$0xff]  }
  0x4a   :  { %1693 = vmatprep.subr.bf16.mxu1 %v2607_v37  ;;  %v2662_v11 = vld [vmem:[#allocation6 + $0x6c4] ss:$16 sps:$4 sm:$0xff]   ;;  %v2660_v13 = vld [vmem:[#allocation6 + $0x6c0] ss:$16 sps:$4 sm:$0xff]   ;;  %v3090_v37 = vcombine.high %v3082_v33, %v3082_v33 }
  0x4b   :  { %v2665_v14 = vld [vmem:[#allocation6 + $0x4a4] ss:$16 sps:$4 sm:$0xff]   ;;  %v2663_v16 = vld [vmem:[#allocation6 + $0x4a0] ss:$16 sps:$4 sm:$0xff]  }
  0x4c   :  { %1653 = vmatpush2.bf16.msra.mxu0 %v2609_v38  ;;  %v2668_v15 = vld [vmem:[#allocation6 + $0x6a4] ss:$16 sps:$4 sm:$0xff]   ;;  %v2666_v17 = vld [vmem:[#allocation6 + $0x6a0] ss:$16 sps:$4 sm:$0xff]  }
  0x4d   :  { %1694 = vmatpush2.bf16.msra.mxu1 %v2610_v39  ;;  %1654 = vmatprep.subr.bf16.mxu0 %v2611_v40  ;;  %v2671_v18 = vld [vmem:[#allocation6 + $0x484] ss:$16 sps:$4 sm:$0xff]   ;;  %v2669_v20 = vld [vmem:[#allocation6 + $0x480] ss:$16 sps:$4 sm:$0xff]  }
  0x4e   :  { %1695 = vmatprep.subr.bf16.mxu1 %v2613_v41  ;;  %v2674_v19 = vld [vmem:[#allocation6 + $0x684] ss:$16 sps:$4 sm:$0xff]   ;;  %v2672_v21 = vld [vmem:[#allocation6 + $0x680] ss:$16 sps:$4 sm:$0xff]  }
  0x4f   :  { %v2677_v22 = vld [vmem:[#allocation6 + $0x464] ss:$16 sps:$4 sm:$0xff]   ;;  %v2675_v24 = vld [vmem:[#allocation6 + $0x460] ss:$16 sps:$4 sm:$0xff]  }
  0x50   :  { %1655 = vmatpush2.bf16.msra.mxu0 %v2615_v42  ;;  %v2680_v23 = vld [vmem:[#allocation6 + $0x664] ss:$16 sps:$4 sm:$0xff]   ;;  %v2678_v25 = vld [vmem:[#allocation6 + $0x660] ss:$16 sps:$4 sm:$0xff]  }
  0x51   :  { %1696 = vmatpush2.bf16.msra.mxu1 %v2616_v43  ;;  %1656 = vmatprep.subr.bf16.mxu0 %v2617_v44  ;;  %v2683_v26 = vld [vmem:[#allocation6 + $0x444] ss:$16 sps:$4 sm:$0xff]   ;;  %v2681_v28 = vld [vmem:[#allocation6 + $0x440] ss:$16 sps:$4 sm:$0xff]  }
  0x52   :  { %1697 = vmatprep.subr.bf16.mxu1 %v2619_v45  ;;  %v2686_v27 = vld [vmem:[#allocation6 + $0x644] ss:$16 sps:$4 sm:$0xff]   ;;  %v2684_v29 = vld [vmem:[#allocation6 + $0x640] ss:$16 sps:$4 sm:$0xff]  }
  0x53   :  { %v2689_v30 = vld [vmem:[#allocation6 + $0x424] ss:$16 sps:$4 sm:$0xff]   ;;  %v2687_v34 = vld [vmem:[#allocation6 + $0x420] ss:$16 sps:$4 sm:$0xff]  }
  0x54   :  { %1657 = vmatpush2.bf16.msra.mxu0 %v2621_v49  ;;  %v2692_v31 = vld [vmem:[#allocation6 + $0x624] ss:$16 sps:$4 sm:$0xff]   ;;  %v2690_v35 = vld [vmem:[#allocation6 + $0x620] ss:$16 sps:$4 sm:$0xff]  }
  0x55   :  { %1698 = vmatpush2.bf16.msra.mxu1 %v2622_v50  ;;  %1658 = vmatprep.subr.bf16.mxu0 %v2623_v52  ;;  %v3080_v32 = vld [vmem:[#allocation3 + $0x10] sm:$0xff] }
  0x56   :  { %1699 = vmatprep.subr.bf16.mxu1 %v2625_v53  ;;  %v3086_v36 = vcombine.high %v3080_v32, %v3080_v32  ;;  %v2695_v38 = vld [vmem:[#allocation6 + $0x404] ss:$16 sps:$4 sm:$0xff]   ;;  %v2693_v40 = vld [vmem:[#allocation6 + $0x400] ss:$16 sps:$4 sm:$0xff]  }
  0x57   :  { %v2698_v39 = vld [vmem:[#allocation6 + $0x604] ss:$16 sps:$4 sm:$0xff]   ;;  %v2696_v41 = vld [vmem:[#allocation6 + $0x600] ss:$16 sps:$4 sm:$0xff]  }
  0x58   :  { %1659 = vmatpush2.bf16.msra.mxu0 %v2627_v54  ;;  %v2701_v42 = vld [vmem:[#allocation6 + $0x5e4] ss:$16 sps:$4 sm:$0xff]   ;;  %v2699_v44 = vld [vmem:[#allocation6 + $0x5e0] ss:$16 sps:$4 sm:$0xff]  }
  0x59   :  { %1700 = vmatpush2.bf16.msra.mxu1 %v2628_v55  ;;  %1660 = vmatprep.subr.bf16.mxu0 %v2629_v56  ;;  %v2704_v43 = vld [vmem:[#allocation6 + $0x7e4] ss:$16 sps:$4 sm:$0xff]   ;;  %v2702_v45 = vld [vmem:[#allocation6 + $0x7e0] ss:$16 sps:$4 sm:$0xff]  }
  0x5a   :  { %1701 = vmatprep.subr.bf16.mxu1 %v2631_v57  ;;  %v2707_v46 = vld [vmem:[#allocation6 + $0x5c4] ss:$16 sps:$4 sm:$0xff]   ;;  %v2705_v49 = vld [vmem:[#allocation6 + $0x5c0] ss:$16 sps:$4 sm:$0xff]  }
  0x5b   :  { %v2710_v48 = vld [vmem:[#allocation6 + $0x7c4] ss:$16 sps:$4 sm:$0xff]   ;;  %v2708_v50 = vld [vmem:[#allocation6 + $0x7c0] ss:$16 sps:$4 sm:$0xff]  }
  0x5c   :  { %1661 = vmatpush2.bf16.msra.mxu0 %v2633_v58  ;;  %v2713_v52 = vld [vmem:[#allocation6 + $0x5a4] ss:$16 sps:$4 sm:$0xff]   ;;  %v2711_v54 = vld [vmem:[#allocation6 + $0x5a0] ss:$16 sps:$4 sm:$0xff]  }
  0x5d   :  { %1702 = vmatpush2.bf16.msra.mxu1 %v2634_v59  ;;  %1662 = vmatprep.subr.bf16.mxu0 %v2635_v60  ;;  %v2716_v53 = vld [vmem:[#allocation6 + $0x7a4] ss:$16 sps:$4 sm:$0xff]   ;;  %v2714_v55 = vld [vmem:[#allocation6 + $0x7a0] ss:$16 sps:$4 sm:$0xff]  }
  0x5e   :  { %1703 = vmatprep.subr.bf16.mxu1 %v2637_v61  ;;  %v2719_v56 = vld [vmem:[#allocation6 + $0x584] ss:$16 sps:$4 sm:$0xff]   ;;  %v2717_v58 = vld [vmem:[#allocation6 + $0x580] ss:$16 sps:$4 sm:$0xff]  }
  0x5f   :  { %v2722_v57 = vld [vmem:[#allocation6 + $0x784] ss:$16 sps:$4 sm:$0xff]   ;;  %v2720_v59 = vld [vmem:[#allocation6 + $0x780] ss:$16 sps:$4 sm:$0xff]  }
  0x60   :  { %1663 = vmatpush2.bf16.msra.mxu0 %v2639_v62  ;;  %v2725_v60 = vld [vmem:[#allocation6 + $0x564] ss:$16 sps:$4 sm:$0xff]   ;;  %v2723_v62 = vld [vmem:[#allocation6 + $0x560] ss:$16 sps:$4 sm:$0xff]  }
  0x61   :  { %1704 = vmatpush2.bf16.msra.mxu1 %v2640_v63  ;;  %1664 = vmatprep.subr.bf16.mxu0 %v2641_v0  ;;  %v2728_v61 = vld [vmem:[#allocation6 + $0x764] ss:$16 sps:$4 sm:$0xff]   ;;  %v2726_v63 = vld [vmem:[#allocation6 + $0x760] ss:$16 sps:$4 sm:$0xff]  }
  0x62   :  { %1705 = vmatprep.subr.bf16.mxu1 %v2643_v1  ;;  %v2731_v0 = vld [vmem:[#allocation6 + $0x544] ss:$16 sps:$4 sm:$0xff]  }
  0x63   :  { %v2734_v1 = vld [vmem:[#allocation6 + $0x744] ss:$16 sps:$4 sm:$0xff]  }
  0x64   :  { %1665 = vmatpush2.bf16.msra.mxu0 %v2645_v2  ;;  %v2729_v2 = vld [vmem:[#allocation6 + $0x540] ss:$16 sps:$4 sm:$0xff]  }
  0x65   :  { %1706 = vmatpush2.bf16.msra.mxu1 %v2646_v3  ;;  %1716 = vmatprep.subr.bf16.mxu0 %v2653_v4  ;;  %v2732_v3 = vld [vmem:[#allocation6 + $0x740] ss:$16 sps:$4 sm:$0xff]   ;;  %v2737_v4 = vld [vmem:[#allocation6 + $0x524] ss:$16 sps:$4 sm:$0xff]  }
  0x66   :  { %1757 = vmatprep.subr.bf16.mxu1 %v2656_v5  ;;  %v2740_v5 = vld [vmem:[#allocation6 + $0x724] ss:$16 sps:$4 sm:$0xff]  }
  0x67   :  { %1667 = vmatmul.mubr.bf16.vlgmr.msra.gmra.mxu0 %v3074_v6 }
  0x68   :  { %1708 = vmatmul.mubr.bf16.vlgmr.msra.gmra.mxu1 %v3076_v7  ;;  %1717 = vmatpush1.bf16.msra.mxu0 %v2651_v8  ;;  %v2735_v8 = vld [vmem:[#allocation6 + $0x520] ss:$16 sps:$4 sm:$0xff]  }
  0x69   :  { %1758 = vmatpush1.bf16.msra.mxu1 %v2654_v9  ;;  %1718 = vmatprep.subr.bf16.mxu0 %v2659_v10  ;;  %v2738_v9 = vld [vmem:[#allocation6 + $0x720] ss:$16 sps:$4 sm:$0xff]   ;;  %v2743_v10 = vld [vmem:[#allocation6 + $0x504] ss:$16 sps:$4 sm:$0xff]  }
  0x6a   :  { %1759 = vmatprep.subr.bf16.mxu1 %v2662_v11  ;;  %1748 = vmatprep.mubr.bf16.mxu0 %v3086_v36  ;;  %v2746_v11 = vld [vmem:[#allocation6 + $0x704] ss:$16 sps:$4 sm:$0xff]  }
  0x6b   :  { %1789 = vmatprep.mubr.bf16.mxu1 %v3090_v37 }
  0x6c   :  { %1719 = vmatpush1.bf16.msra.mxu0 %v2657_v12  ;;  %v2741_v12 = vld [vmem:[#allocation6 + $0x500] ss:$16 sps:$4 sm:$0xff]  }
  0x6d   :  { %1760 = vmatpush1.bf16.msra.mxu1 %v2660_v13  ;;  %1720 = vmatprep.subr.bf16.mxu0 %v2665_v14  ;;  %v2744_v13 = vld [vmem:[#allocation6 + $0x700] ss:$16 sps:$4 sm:$0xff]   ;;  %v2753_v14 = vld [vmem:[#allocation6 + $0xec] ss:$16 sps:$4 sm:$0xff]  }
  0x6e   :  { %1761 = vmatprep.subr.bf16.mxu1 %v2668_v15  ;;  %v2756_v15 = vld [vmem:[#allocation6 + $0x2ec] ss:$16 sps:$4 sm:$0xff]  }
  0x70   :  { %1721 = vmatpush1.bf16.msra.mxu0 %v2663_v16  ;;  %v3096_v16 = vcombine.low %v3080_v32, %v3080_v32  ;;  %v2777_v32 = vld [vmem:[#allocation6 + $0x6c] ss:$16 sps:$4 sm:$0xff]  }
  0x71   :  { %1762 = vmatpush1.bf16.msra.mxu1 %v2666_v17  ;;  %1722 = vmatprep.subr.bf16.mxu0 %v2671_v18  ;;  %v3100_v17 = vcombine.low %v3082_v33, %v3082_v33  ;;  %v2751_v18 = vld [vmem:[#allocation6 + $0xe8] ss:$16 sps:$4 sm:$0xff]   ;;  %v2780_v33 = vld [vmem:[#allocation6 + $0x26c] ss:$16 sps:$4 sm:$0xff]  }
  0x72   :  { %1763 = vmatprep.subr.bf16.mxu1 %v2674_v19  ;;  %v2754_v19 = vld [vmem:[#allocation6 + $0x2e8] ss:$16 sps:$4 sm:$0xff]  }
  0x74   :  { %1723 = vmatpush1.bf16.msra.mxu0 %v2669_v20  ;;  %v2759_v20 = vld [vmem:[#allocation6 + $0xcc] ss:$16 sps:$4 sm:$0xff]  }
  0x75   :  { %1764 = vmatpush1.bf16.msra.mxu1 %v2672_v21  ;;  %1724 = vmatprep.subr.bf16.mxu0 %v2677_v22  ;;  %v2762_v21 = vld [vmem:[#allocation6 + $0x2cc] ss:$16 sps:$4 sm:$0xff]   ;;  %v2757_v22 = vld [vmem:[#allocation6 + $0xc8] ss:$16 sps:$4 sm:$0xff]  }
  0x76   :  { %1765 = vmatprep.subr.bf16.mxu1 %v2680_v23  ;;  %v2760_v23 = vld [vmem:[#allocation6 + $0x2c8] ss:$16 sps:$4 sm:$0xff]  }
  0x78   :  { %1725 = vmatpush1.bf16.msra.mxu0 %v2675_v24  ;;  %v2765_v24 = vld [vmem:[#allocation6 + $0xac] ss:$16 sps:$4 sm:$0xff]  }
  0x79   :  { %1766 = vmatpush1.bf16.msra.mxu1 %v2678_v25  ;;  %1726 = vmatprep.subr.bf16.mxu0 %v2683_v26  ;;  %v2768_v25 = vld [vmem:[#allocation6 + $0x2ac] ss:$16 sps:$4 sm:$0xff]   ;;  %v2763_v26 = vld [vmem:[#allocation6 + $0xa8] ss:$16 sps:$4 sm:$0xff]  }
  0x7a   :  { %1767 = vmatprep.subr.bf16.mxu1 %v2686_v27  ;;  %v2766_v27 = vld [vmem:[#allocation6 + $0x2a8] ss:$16 sps:$4 sm:$0xff]  }
  0x7c   :  { %1727 = vmatpush1.bf16.msra.mxu0 %v2681_v28  ;;  %v2771_v28 = vld [vmem:[#allocation6 + $0x8c] ss:$16 sps:$4 sm:$0xff]  }
  0x7d   :  { %1768 = vmatpush1.bf16.msra.mxu1 %v2684_v29  ;;  %1728 = vmatprep.subr.bf16.mxu0 %v2689_v30  ;;  %v2774_v29 = vld [vmem:[#allocation6 + $0x28c] ss:$16 sps:$4 sm:$0xff]   ;;  %v2769_v30 = vld [vmem:[#allocation6 + $0x88] ss:$16 sps:$4 sm:$0xff]  }
  0x7e   :  { %1769 = vmatprep.subr.bf16.mxu1 %v2692_v31  ;;  %v2772_v31 = vld [vmem:[#allocation6 + $0x288] ss:$16 sps:$4 sm:$0xff]  }
  0x80   :  { %1729 = vmatpush1.bf16.msra.mxu0 %v2687_v34  ;;  %v2775_v34 = vld [vmem:[#allocation6 + $0x68] ss:$16 sps:$4 sm:$0xff]  }
  0x81   :  { %1770 = vmatpush1.bf16.msra.mxu1 %v2690_v35  ;;  %1730 = vmatprep.subr.bf16.mxu0 %v2695_v38  ;;  %v2786_v35 = vld [vmem:[#allocation6 + $0x24c] ss:$16 sps:$4 sm:$0xff]   ;;  %v2781_v38 = vld [vmem:[#allocation6 + $0x48] ss:$16 sps:$4 sm:$0xff]  }
  0x82   :  { %1771 = vmatprep.subr.bf16.mxu1 %v2698_v39  ;;  %v2784_v39 = vld [vmem:[#allocation6 + $0x248] ss:$16 sps:$4 sm:$0xff]  }
  0x84   :  { %1731 = vmatpush1.bf16.msra.mxu0 %v2693_v40  ;;  %v2789_v40 = vld [vmem:[#allocation6 + $0x2c] ss:$16 sps:$4 sm:$0xff]  }
  0x85   :  { %1772 = vmatpush1.bf16.msra.mxu1 %v2696_v41  ;;  %1732 = vmatprep.subr.bf16.mxu0 %v2701_v42  ;;  %v2792_v41 = vld [vmem:[#allocation6 + $0x22c] ss:$16 sps:$4 sm:$0xff]   ;;  %v2787_v42 = vld [vmem:[#allocation6 + $0x28] ss:$16 sps:$4 sm:$0xff]  }
  0x86   :  { %1773 = vmatprep.subr.bf16.mxu1 %v2704_v43  ;;  %v2790_v43 = vld [vmem:[#allocation6 + $0x228] ss:$16 sps:$4 sm:$0xff]  }
  0x88   :  { %1733 = vmatpush2.bf16.msra.mxu0 %v2699_v44  ;;  %v2795_v44 = vld [vmem:[#allocation6 + $0xc] ss:$16 sps:$4 sm:$0xff]  }
  0x89   :  { %1774 = vmatpush2.bf16.msra.mxu1 %v2702_v45  ;;  %1734 = vmatprep.subr.bf16.mxu0 %v2707_v46  ;;  %v2798_v45 = vld [vmem:[#allocation6 + $0x20c] ss:$16 sps:$4 sm:$0xff]   ;;  %v2793_v46 = vld [vmem:[#allocation6 + $0x8] ss:$16 sps:$4 sm:$0xff]  }
  0x8a   :  { %1775 = vmatprep.subr.bf16.mxu1 %v2710_v48  ;;  %v2796_v48 = vld [vmem:[#allocation6 + $0x208] ss:$16 sps:$4 sm:$0xff]  }
  0x8c   :  { %1735 = vmatpush2.bf16.msra.mxu0 %v2705_v49  ;;  %v2801_v49 = vld [vmem:[#allocation6 + $0x1ec] ss:$16 sps:$4 sm:$0xff]  }
  0x8d   :  { %1776 = vmatpush2.bf16.msra.mxu1 %v2708_v50  ;;  %1736 = vmatprep.subr.bf16.mxu0 %v2713_v52  ;;  %v2804_v50 = vld [vmem:[#allocation6 + $0x3ec] ss:$16 sps:$4 sm:$0xff]   ;;  %v2799_v52 = vld [vmem:[#allocation6 + $0x1e8] ss:$16 sps:$4 sm:$0xff]  }
  0x8e   :  { %1777 = vmatprep.subr.bf16.mxu1 %v2716_v53  ;;  %v2802_v53 = vld [vmem:[#allocation6 + $0x3e8] ss:$16 sps:$4 sm:$0xff]  }
  0x90   :  { %1737 = vmatpush2.bf16.msra.mxu0 %v2711_v54  ;;  %v2807_v54 = vld [vmem:[#allocation6 + $0x1cc] ss:$16 sps:$4 sm:$0xff]  }
  0x91   :  { %1778 = vmatpush2.bf16.msra.mxu1 %v2714_v55  ;;  %1738 = vmatprep.subr.bf16.mxu0 %v2719_v56  ;;  %v2810_v55 = vld [vmem:[#allocation6 + $0x3cc] ss:$16 sps:$4 sm:$0xff]   ;;  %v2805_v56 = vld [vmem:[#allocation6 + $0x1c8] ss:$16 sps:$4 sm:$0xff]  }
  0x92   :  { %1779 = vmatprep.subr.bf16.mxu1 %v2722_v57  ;;  %v2808_v57 = vld [vmem:[#allocation6 + $0x3c8] ss:$16 sps:$4 sm:$0xff]  }
  0x94   :  { %1739 = vmatpush2.bf16.msra.mxu0 %v2717_v58  ;;  %v2813_v58 = vld [vmem:[#allocation6 + $0x1ac] ss:$16 sps:$4 sm:$0xff]  }
  0x95   :  { %1780 = vmatpush2.bf16.msra.mxu1 %v2720_v59  ;;  %1740 = vmatprep.subr.bf16.mxu0 %v2725_v60  ;;  %v2816_v59 = vld [vmem:[#allocation6 + $0x3ac] ss:$16 sps:$4 sm:$0xff]   ;;  %v2811_v60 = vld [vmem:[#allocation6 + $0x1a8] ss:$16 sps:$4 sm:$0xff]  }
  0x96   :  { %1781 = vmatprep.subr.bf16.mxu1 %v2728_v61  ;;  %v2814_v61 = vld [vmem:[#allocation6 + $0x3a8] ss:$16 sps:$4 sm:$0xff]  }
  0x98   :  { %1741 = vmatpush2.bf16.msra.mxu0 %v2723_v62  ;;  %v2819_v62 = vld [vmem:[#allocation6 + $0x18c] ss:$16 sps:$4 sm:$0xff]  }
  0x99   :  { %1782 = vmatpush2.bf16.msra.mxu1 %v2726_v63  ;;  %1742 = vmatprep.subr.bf16.mxu0 %v2731_v0  ;;  %v2822_v63 = vld [vmem:[#allocation6 + $0x38c] ss:$16 sps:$4 sm:$0xff]   ;;  %v2817_v0 = vld [vmem:[#allocation6 + $0x188] ss:$16 sps:$4 sm:$0xff]  }
  0x9a   :  { %1783 = vmatprep.subr.bf16.mxu1 %v2734_v1  ;;  %v2820_v1 = vld [vmem:[#allocation6 + $0x388] ss:$16 sps:$4 sm:$0xff]  }
  0x9c   :  { %1743 = vmatpush2.bf16.msra.mxu0 %v2729_v2  ;;  %v2825_v2 = vld [vmem:[#allocation6 + $0x16c] ss:$16 sps:$4 sm:$0xff]  }
  0x9d   :  { %1784 = vmatpush2.bf16.msra.mxu1 %v2732_v3  ;;  %1744 = vmatprep.subr.bf16.mxu0 %v2737_v4  ;;  %v2828_v3 = vld [vmem:[#allocation6 + $0x36c] ss:$16 sps:$4 sm:$0xff]   ;;  %v2823_v4 = vld [vmem:[#allocation6 + $0x168] ss:$16 sps:$4 sm:$0xff]  }
  0x9e   :  { %1785 = vmatprep.subr.bf16.mxu1 %v2740_v5  ;;  %v2826_v5 = vld [vmem:[#allocation6 + $0x368] ss:$16 sps:$4 sm:$0xff]  }
  0xa0   :  { %1745 = vmatpush2.bf16.msra.mxu0 %v2735_v8  ;;  %v2831_v8 = vld [vmem:[#allocation6 + $0x14c] ss:$16 sps:$4 sm:$0xff]  }
  0xa1   :  { %1786 = vmatpush2.bf16.msra.mxu1 %v2738_v9  ;;  %1746 = vmatprep.subr.bf16.mxu0 %v2743_v10  ;;  %v2834_v9 = vld [vmem:[#allocation6 + $0x34c] ss:$16 sps:$4 sm:$0xff]   ;;  %v2829_v10 = vld [vmem:[#allocation6 + $0x148] ss:$16 sps:$4 sm:$0xff]  }
  0xa2   :  { %1787 = vmatprep.subr.bf16.mxu1 %v2746_v11  ;;  %v2832_v11 = vld [vmem:[#allocation6 + $0x348] ss:$16 sps:$4 sm:$0xff]  }
  0xa4   :  { %1747 = vmatpush2.bf16.msra.mxu0 %v2741_v12  ;;  %v2837_v12 = vld [vmem:[#allocation6 + $0x12c] ss:$16 sps:$4 sm:$0xff]  }
  0xa5   :  { %1788 = vmatpush2.bf16.msra.mxu1 %v2744_v13  ;;  %1798 = vmatprep.subr.bf16.mxu0 %v2753_v14  ;;  %v2840_v13 = vld [vmem:[#allocation6 + $0x32c] ss:$16 sps:$4 sm:$0xff]   ;;  %v2835_v14 = vld [vmem:[#allocation6 + $0x128] ss:$16 sps:$4 sm:$0xff]  }
  0xa6   :  { %1839 = vmatprep.subr.bf16.mxu1 %v2756_v15  ;;  %v2838_v15 = vld [vmem:[#allocation6 + $0x328] ss:$16 sps:$4 sm:$0xff]  }
  0xa7   :  { %1749 = vmatmul.mubr.bf16.vlgmr.msra.gmra.mxu0 %v3096_v16 }
  0xa8   :  { %1790 = vmatmul.mubr.bf16.vlgmr.msra.gmra.mxu1 %v3100_v17  ;;  %1799 = vmatpush1.bf16.msra.mxu0 %v2751_v18  ;;  %v2843_v18 = vld [vmem:[#allocation6 + $0x10c] ss:$16 sps:$4 sm:$0xff]  }
  0xa9   :  { %1840 = vmatpush1.bf16.msra.mxu1 %v2754_v19  ;;  %1800 = vmatprep.subr.bf16.mxu0 %v2759_v20  ;;  %v2846_v19 = vld [vmem:[#allocation6 + $0x30c] ss:$16 sps:$4 sm:$0xff]   ;;  %v2841_v20 = vld [vmem:[#allocation6 + $0x108] ss:$16 sps:$4 sm:$0xff]  }
  0xaa   :  { %1841 = vmatprep.subr.bf16.mxu1 %v2762_v21  ;;  %1830 = vmatprep.mubr.bf16.mxu0 %v3068_v47  ;;  %v2778_v47 = vld [vmem:[#allocation6 + $0x268] ss:$16 sps:$4 sm:$0xff]  }
  0xab   :  { %1871 = vmatprep.mubr.bf16.mxu1 %v3070_v51  ;;  %v2783_v51 = vld [vmem:[#allocation6 + $0x4c] ss:$16 sps:$4 sm:$0xff]   ;;  %v2844_v21 = vld [vmem:[#allocation6 + $0x308] ss:$16 sps:$4 sm:$0xff]  }
  0xac   :  { %1801 = vmatpush1.bf16.msra.mxu0 %v2757_v22  ;;  %v2849_v22 = vld [vmem:[#allocation6 + $0x4ec] ss:$16 sps:$4 sm:$0xff]  }
  0xad   :  { %1842 = vmatpush1.bf16.msra.mxu1 %v2760_v23  ;;  %1802 = vmatprep.subr.bf16.mxu0 %v2765_v24  ;;  %v2852_v23 = vld [vmem:[#allocation6 + $0x6ec] ss:$16 sps:$4 sm:$0xff]   ;;  %v2847_v24 = vld [vmem:[#allocation6 + $0x4e8] ss:$16 sps:$4 sm:$0xff]  }
  0xae   :  { %1843 = vmatprep.subr.bf16.mxu1 %v2768_v25  ;;  %v2850_v25 = vld [vmem:[#allocation6 + $0x6e8] ss:$16 sps:$4 sm:$0xff]  }
  0xb0   :  { %1803 = vmatpush1.bf16.msra.mxu0 %v2763_v26  ;;  %v2855_v26 = vld [vmem:[#allocation6 + $0x4cc] ss:$16 sps:$4 sm:$0xff]  }
  0xb1   :  { %1844 = vmatpush1.bf16.msra.mxu1 %v2766_v27  ;;  %1804 = vmatprep.subr.bf16.mxu0 %v2771_v28  ;;  %v2858_v27 = vld [vmem:[#allocation6 + $0x6cc] ss:$16 sps:$4 sm:$0xff]   ;;  %v2853_v28 = vld [vmem:[#allocation6 + $0x4c8] ss:$16 sps:$4 sm:$0xff]  }
  0xb2   :  { %1845 = vmatprep.subr.bf16.mxu1 %v2774_v29  ;;  %v2856_v29 = vld [vmem:[#allocation6 + $0x6c8] ss:$16 sps:$4 sm:$0xff]  }
  0xb4   :  { %1805 = vmatpush1.bf16.msra.mxu0 %v2769_v30  ;;  %v2861_v30 = vld [vmem:[#allocation6 + $0x4ac] ss:$16 sps:$4 sm:$0xff]  }
  0xb5   :  { %1846 = vmatpush1.bf16.msra.mxu1 %v2772_v31  ;;  %1806 = vmatprep.subr.bf16.mxu0 %v2777_v32  ;;  %v2864_v31 = vld [vmem:[#allocation6 + $0x6ac] ss:$16 sps:$4 sm:$0xff]   ;;  %v2859_v32 = vld [vmem:[#allocation6 + $0x4a8] ss:$16 sps:$4 sm:$0xff]  }
  0xb6   :  { %1847 = vmatprep.subr.bf16.mxu1 %v2780_v33  ;;  %v2862_v33 = vld [vmem:[#allocation6 + $0x6a8] ss:$16 sps:$4 sm:$0xff]  }
  0xb8   :  { %1807 = vmatpush1.bf16.msra.mxu0 %v2775_v34  ;;  %v2865_v34 = vld [vmem:[#allocation6 + $0x488] ss:$16 sps:$4 sm:$0xff]  }
  0xb9   :  { %1848 = vmatpush1.bf16.msra.mxu1 %v2778_v47  ;;  %1808 = vmatprep.subr.bf16.mxu0 %v2783_v51  ;;  %v2868_v47 = vld [vmem:[#allocation6 + $0x688] ss:$16 sps:$4 sm:$0xff]   ;;  %v2873_v51 = vld [vmem:[#allocation6 + $0x46c] ss:$16 sps:$4 sm:$0xff]  }
  0xba   :  { %1849 = vmatprep.subr.bf16.mxu1 %v2786_v35  ;;  %v2876_v35 = vld [vmem:[#allocation6 + $0x66c] ss:$16 sps:$4 sm:$0xff]  }
  0xbc   :  { %1809 = vmatpush1.bf16.msra.mxu0 %v2781_v38  ;;  %v2879_v38 = vld [vmem:[#allocation6 + $0x44c] ss:$16 sps:$4 sm:$0xff]  }
  0xbd   :  { %1850 = vmatpush1.bf16.msra.mxu1 %v2784_v39  ;;  %1810 = vmatprep.subr.bf16.mxu0 %v2789_v40  ;;  %v2882_v39 = vld [vmem:[#allocation6 + $0x64c] ss:$16 sps:$4 sm:$0xff]   ;;  %v2877_v40 = vld [vmem:[#allocation6 + $0x448] ss:$16 sps:$4 sm:$0xff]  }
  0xbe   :  { %1851 = vmatprep.subr.bf16.mxu1 %v2792_v41  ;;  %v2880_v41 = vld [vmem:[#allocation6 + $0x648] ss:$16 sps:$4 sm:$0xff]  }
  0xc0   :  { %1811 = vmatpush1.bf16.msra.mxu0 %v2787_v42  ;;  %v2885_v42 = vld [vmem:[#allocation6 + $0x42c] ss:$16 sps:$4 sm:$0xff]  }
  0xc1   :  { %1852 = vmatpush1.bf16.msra.mxu1 %v2790_v43  ;;  %1812 = vmatprep.subr.bf16.mxu0 %v2795_v44  ;;  %v2888_v43 = vld [vmem:[#allocation6 + $0x62c] ss:$16 sps:$4 sm:$0xff]   ;;  %v2883_v44 = vld [vmem:[#allocation6 + $0x428] ss:$16 sps:$4 sm:$0xff]  }
  0xc2   :  { %1853 = vmatprep.subr.bf16.mxu1 %v2798_v45  ;;  %v2886_v45 = vld [vmem:[#allocation6 + $0x628] ss:$16 sps:$4 sm:$0xff]  }
  0xc4   :  { %1813 = vmatpush1.bf16.msra.mxu0 %v2793_v46  ;;  %v2891_v46 = vld [vmem:[#allocation6 + $0x40c] ss:$16 sps:$4 sm:$0xff]  }
  0xc5   :  { %1854 = vmatpush1.bf16.msra.mxu1 %v2796_v48  ;;  %1814 = vmatprep.subr.bf16.mxu0 %v2801_v49  ;;  %v2894_v48 = vld [vmem:[#allocation6 + $0x60c] ss:$16 sps:$4 sm:$0xff]   ;;  %v2889_v49 = vld [vmem:[#allocation6 + $0x408] ss:$16 sps:$4 sm:$0xff]  }
  0xc6   :  { %1855 = vmatprep.subr.bf16.mxu1 %v2804_v50  ;;  %v2892_v50 = vld [vmem:[#allocation6 + $0x608] ss:$16 sps:$4 sm:$0xff]  }
  0xc8   :  { %1815 = vmatpush2.bf16.msra.mxu0 %v2799_v52  ;;  %v2897_v52 = vld [vmem:[#allocation6 + $0x5ec] ss:$16 sps:$4 sm:$0xff]  }
  0xc9   :  { %1856 = vmatpush2.bf16.msra.mxu1 %v2802_v53  ;;  %1816 = vmatprep.subr.bf16.mxu0 %v2807_v54  ;;  %v2900_v53 = vld [vmem:[#allocation6 + $0x7ec] ss:$16 sps:$4 sm:$0xff]   ;;  %v2895_v54 = vld [vmem:[#allocation6 + $0x5e8] ss:$16 sps:$4 sm:$0xff]  }
  0xca   :  { %1857 = vmatprep.subr.bf16.mxu1 %v2810_v55  ;;  %v2898_v55 = vld [vmem:[#allocation6 + $0x7e8] ss:$16 sps:$4 sm:$0xff]  }
  0xcc   :  { %1817 = vmatpush2.bf16.msra.mxu0 %v2805_v56  ;;  %v2903_v56 = vld [vmem:[#allocation6 + $0x5cc] ss:$16 sps:$4 sm:$0xff]  }
  0xcd   :  { %1858 = vmatpush2.bf16.msra.mxu1 %v2808_v57  ;;  %1818 = vmatprep.subr.bf16.mxu0 %v2813_v58  ;;  %v2906_v57 = vld [vmem:[#allocation6 + $0x7cc] ss:$16 sps:$4 sm:$0xff]   ;;  %v2901_v58 = vld [vmem:[#allocation6 + $0x5c8] ss:$16 sps:$4 sm:$0xff]  }
  0xce   :  { %1859 = vmatprep.subr.bf16.mxu1 %v2816_v59  ;;  %v2904_v59 = vld [vmem:[#allocation6 + $0x7c8] ss:$16 sps:$4 sm:$0xff]  }
  0xd0   :  { %1819 = vmatpush2.bf16.msra.mxu0 %v2811_v60  ;;  %v2909_v60 = vld [vmem:[#allocation6 + $0x5ac] ss:$16 sps:$4 sm:$0xff]  }
  0xd1   :  { %1860 = vmatpush2.bf16.msra.mxu1 %v2814_v61  ;;  %1820 = vmatprep.subr.bf16.mxu0 %v2819_v62  ;;  %v2912_v61 = vld [vmem:[#allocation6 + $0x7ac] ss:$16 sps:$4 sm:$0xff]   ;;  %v2907_v62 = vld [vmem:[#allocation6 + $0x5a8] ss:$16 sps:$4 sm:$0xff]  }
  0xd2   :  { %1861 = vmatprep.subr.bf16.mxu1 %v2822_v63  ;;  %v2910_v63 = vld [vmem:[#allocation6 + $0x7a8] ss:$16 sps:$4 sm:$0xff]  }
  0xd4   :  { %1821 = vmatpush2.bf16.msra.mxu0 %v2817_v0  ;;  %v2915_v0 = vld [vmem:[#allocation6 + $0x58c] ss:$16 sps:$4 sm:$0xff]  }
  0xd5   :  { %1862 = vmatpush2.bf16.msra.mxu1 %v2820_v1  ;;  %1822 = vmatprep.subr.bf16.mxu0 %v2825_v2  ;;  %v2918_v1 = vld [vmem:[#allocation6 + $0x78c] ss:$16 sps:$4 sm:$0xff]   ;;  %v2913_v2 = vld [vmem:[#allocation6 + $0x588] ss:$16 sps:$4 sm:$0xff]  }
  0xd6   :  { %1863 = vmatprep.subr.bf16.mxu1 %v2828_v3  ;;  %v2916_v3 = vld [vmem:[#allocation6 + $0x788] ss:$16 sps:$4 sm:$0xff]  }
  0xd8   :  { %1823 = vmatpush2.bf16.msra.mxu0 %v2823_v4  ;;  %v2921_v4 = vld [vmem:[#allocation6 + $0x56c] ss:$16 sps:$4 sm:$0xff]  }
  0xd9   :  { %1864 = vmatpush2.bf16.msra.mxu1 %v2826_v5  ;;  %1824 = vmatprep.subr.bf16.mxu0 %v2831_v8  ;;  %v2924_v5 = vld [vmem:[#allocation6 + $0x76c] ss:$16 sps:$4 sm:$0xff]   ;;  %v2919_v8 = vld [vmem:[#allocation6 + $0x568] ss:$16 sps:$4 sm:$0xff]  }
  0xda   :  { %1865 = vmatprep.subr.bf16.mxu1 %v2834_v9  ;;  %v2922_v9 = vld [vmem:[#allocation6 + $0x768] ss:$16 sps:$4 sm:$0xff]  }
  0xdc   :  { %1825 = vmatpush2.bf16.msra.mxu0 %v2829_v10  ;;  %v2927_v10 = vld [vmem:[#allocation6 + $0x54c] ss:$16 sps:$4 sm:$0xff]  }
  0xdd   :  { %1866 = vmatpush2.bf16.msra.mxu1 %v2832_v11  ;;  %1826 = vmatprep.subr.bf16.mxu0 %v2837_v12  ;;  %v2930_v11 = vld [vmem:[#allocation6 + $0x74c] ss:$16 sps:$4 sm:$0xff]   ;;  %v2925_v12 = vld [vmem:[#allocation6 + $0x548] ss:$16 sps:$4 sm:$0xff]  }
  0xde   :  { %1867 = vmatprep.subr.bf16.mxu1 %v2840_v13  ;;  %v2928_v13 = vld [vmem:[#allocation6 + $0x748] ss:$16 sps:$4 sm:$0xff]  }
  0xe0   :  { %1827 = vmatpush2.bf16.msra.mxu0 %v2835_v14  ;;  %v2933_v14 = vld [vmem:[#allocation6 + $0x52c] ss:$16 sps:$4 sm:$0xff]  }
  0xe1   :  { %1868 = vmatpush2.bf16.msra.mxu1 %v2838_v15  ;;  %1828 = vmatprep.subr.bf16.mxu0 %v2843_v18  ;;  %v2936_v15 = vld [vmem:[#allocation6 + $0x72c] ss:$16 sps:$4 sm:$0xff]   ;;  %v2931_v18 = vld [vmem:[#allocation6 + $0x528] ss:$16 sps:$4 sm:$0xff]  }
  0xe2   :  { %1869 = vmatprep.subr.bf16.mxu1 %v2846_v19  ;;  %v2934_v19 = vld [vmem:[#allocation6 + $0x728] ss:$16 sps:$4 sm:$0xff]  }
  0xe4   :  { %1829 = vmatpush2.bf16.msra.mxu0 %v2841_v20  ;;  %v2939_v20 = vld [vmem:[#allocation6 + $0x50c] ss:$16 sps:$4 sm:$0xff]  }
  0xe5   :  { %1870 = vmatpush2.bf16.msra.mxu1 %v2844_v21  ;;  %1880 = vmatprep.subr.bf16.mxu0 %v2849_v22  ;;  %v2942_v21 = vld [vmem:[#allocation6 + $0x70c] ss:$16 sps:$4 sm:$0xff]   ;;  %v2937_v22 = vld [vmem:[#allocation6 + $0x508] ss:$16 sps:$4 sm:$0xff]  }
  0xe6   :  { %1921 = vmatprep.subr.bf16.mxu1 %v2852_v23  ;;  %v2940_v23 = vld [vmem:[#allocation6 + $0x708] ss:$16 sps:$4 sm:$0xff]  }
  0xe7   :  { %1831 = vmatmul.mubr.bf16.vlgmr.msra.gmra.mxu0 %v3074_v6  ;;  %v2867_v6 = vld [vmem:[#allocation6 + $0x48c] ss:$16 sps:$4 sm:$0xff]  }
  0xe8   :  { %1872 = vmatmul.mubr.bf16.vlgmr.msra.gmra.mxu1 %v3076_v7  ;;  %1881 = vmatpush1.bf16.msra.mxu0 %v2847_v24  ;;  %v2870_v7 = vld [vmem:[#allocation6 + $0x68c] ss:$16 sps:$4 sm:$0xff]  }
  0xe9   :  { %1922 = vmatpush1.bf16.msra.mxu1 %v2850_v25  ;;  %1882 = vmatprep.subr.bf16.mxu0 %v2855_v26  ;;  %v2018_v24 = vld [vmem:[#allocation8 + $0xf8] sm:$0xff]  ;;  %v2017_v26 = vld [vmem:[#allocation8 + $0xf0] sm:$0xff] }
  0xea   :  { %1923 = vmatprep.subr.bf16.mxu1 %v2858_v27  ;;  %1912 = vmatprep.mubr.bf16.mxu0 %v3086_v36  ;;  %v2871_v36 = vld [vmem:[#allocation6 + $0x468] ss:$16 sps:$4 sm:$0xff]  }
  0xeb   :  { %1953 = vmatprep.mubr.bf16.mxu1 %v3090_v37  ;;  %v2874_v37 = vld [vmem:[#allocation6 + $0x668] ss:$16 sps:$4 sm:$0xff]  }
  0xec   :  { %1883 = vmatpush1.bf16.msra.mxu0 %v2853_v28  ;;  %v2002_v25 = vld [vmem:[#allocation8 + $0x78] sm:$0xff] }
  0xed   :  { %1924 = vmatpush1.bf16.msra.mxu1 %v2856_v29  ;;  %1884 = vmatprep.subr.bf16.mxu0 %v2861_v30  ;;  %v2001_v29 = vld [vmem:[#allocation8 + $0x70] sm:$0xff] }
  0xee   :  { %1925 = vmatprep.subr.bf16.mxu1 %v2864_v31  ;;  %v2016_v31 = vld [vmem:[#allocation8 + $0xe8] sm:$0xff] }
  0xf0   :  { %1885 = vmatpush1.bf16.msra.mxu0 %v2859_v32 }
  0xf1   :  { %1926 = vmatpush1.bf16.msra.mxu1 %v2862_v33  ;;  %1886 = vmatprep.subr.bf16.mxu0 %v2867_v6  ;;  %v2000_v6 = vld [vmem:[#allocation8 + $0x68] sm:$0xff] }
  0xf2   :  { %1927 = vmatprep.subr.bf16.mxu1 %v2870_v7  ;;  %v2015_v7 = vld [vmem:[#allocation8 + $0xe0] sm:$0xff] }
  0xf4   :  { %1887 = vmatpush1.bf16.msra.mxu0 %v2865_v34 }
  0xf5   :  { %1928 = vmatpush1.bf16.msra.mxu1 %v2868_v47  ;;  %1888 = vmatprep.subr.bf16.mxu0 %v2873_v51  ;;  %v1999_v51 = vld [vmem:[#allocation8 + $0x60] sm:$0xff] }
  0xf6   :  { %1929 = vmatprep.subr.bf16.mxu1 %v2876_v35 }
  0xf8   :  { %1889 = vmatpush1.bf16.msra.mxu0 %v2871_v36 }
  0xf9   :  { %1930 = vmatpush1.bf16.msra.mxu1 %v2874_v37  ;;  %1890 = vmatprep.subr.bf16.mxu0 %v2879_v38  ;;  %v2050_v37 = vld [vmem:[#allocation8 + $0x1f8] sm:$0xff] }
  0xfa   :  { %1931 = vmatprep.subr.bf16.mxu1 %v2882_v39  ;;  %v2034_v38 = vld [vmem:[#allocation8 + $0x178] sm:$0xff]  ;;  %v2049_v39 = vld [vmem:[#allocation8 + $0x1f0] sm:$0xff] }
  0xfc   :  { %1891 = vmatpush1.bf16.msra.mxu0 %v2877_v40  ;;  %v2013_v40 = vld [vmem:[#allocation8 + $0xd0] sm:$0xff] }
  0xfd   :  { %1932 = vmatpush1.bf16.msra.mxu1 %v2880_v41  ;;  %1892 = vmatprep.subr.bf16.mxu0 %v2885_v42  ;;  %v2033_v41 = vld [vmem:[#allocation8 + $0x170] sm:$0xff] }
  0xfe   :  { %1933 = vmatprep.subr.bf16.mxu1 %v2888_v43  ;;  %v1997_v42 = vld [vmem:[#allocation8 + $0x50] sm:$0xff]  ;;  %v2048_v43 = vld [vmem:[#allocation8 + $0x1e8] sm:$0xff] }
 0x100   :  { %1893 = vmatpush1.bf16.msra.mxu0 %v2883_v44  ;;  %v2012_v44 = vld [vmem:[#allocation8 + $0xc8] sm:$0xff] }
 0x101   :  { %1934 = vmatpush1.bf16.msra.mxu1 %v2886_v45  ;;  %1894 = vmatprep.subr.bf16.mxu0 %v2891_v46  ;;  %v2032_v45 = vld [vmem:[#allocation8 + $0x168] sm:$0xff] }
 0x102   :  { %1935 = vmatprep.subr.bf16.mxu1 %v2894_v48  ;;  %v1996_v46 = vld [vmem:[#allocation8 + $0x48] sm:$0xff]  ;;  %v2047_v48 = vld [vmem:[#allocation8 + $0x1e0] sm:$0xff] }
 0x104   :  { %1895 = vmatpush1.bf16.msra.mxu0 %v2889_v49  ;;  %v2011_v49 = vld [vmem:[#allocation8 + $0xc0] sm:$0xff] }
 0x105   :  { %1936 = vmatpush1.bf16.msra.mxu1 %v2892_v50  ;;  %1896 = vmatprep.subr.bf16.mxu0 %v2897_v52  ;;  %v2031_v50 = vld [vmem:[#allocation8 + $0x160] sm:$0xff] }
 0x106   :  { %1937 = vmatprep.subr.bf16.mxu1 %v2900_v53  ;;  %v1995_v52 = vld [vmem:[#allocation8 + $0x40] sm:$0xff]  ;;  %v2046_v53 = vld [vmem:[#allocation8 + $0x1d8] sm:$0xff] }
 0x108   :  { %1897 = vmatpush2.bf16.msra.mxu0 %v2895_v54  ;;  %v2010_v54 = vld [vmem:[#allocation8 + $0xb8] sm:$0xff] }
 0x109   :  { %1938 = vmatpush2.bf16.msra.mxu1 %v2898_v55  ;;  %1898 = vmatprep.subr.bf16.mxu0 %v2903_v56  ;;  %v2030_v55 = vld [vmem:[#allocation8 + $0x158] sm:$0xff] }
 0x10a   :  { %1939 = vmatprep.subr.bf16.mxu1 %v2906_v57  ;;  %v1994_v56 = vld [vmem:[#allocation8 + $0x38] sm:$0xff]  ;;  %v2045_v57 = vld [vmem:[#allocation8 + $0x1d0] sm:$0xff] }
 0x10c   :  { %1899 = vmatpush2.bf16.msra.mxu0 %v2901_v58  ;;  %v2009_v58 = vld [vmem:[#allocation8 + $0xb0] sm:$0xff] }
 0x10d   :  { %1940 = vmatpush2.bf16.msra.mxu1 %v2904_v59  ;;  %1900 = vmatprep.subr.bf16.mxu0 %v2909_v60  ;;  %v2029_v59 = vld [vmem:[#allocation8 + $0x150] sm:$0xff] }
 0x10e   :  { %1941 = vmatprep.subr.bf16.mxu1 %v2912_v61  ;;  %v1993_v60 = vld [vmem:[#allocation8 + $0x30] sm:$0xff]  ;;  %v2044_v61 = vld [vmem:[#allocation8 + $0x1c8] sm:$0xff] }
 0x110   :  { %1901 = vmatpush2.bf16.msra.mxu0 %v2907_v62  ;;  %v2008_v62 = vld [vmem:[#allocation8 + $0xa8] sm:$0xff] }
 0x111   :  { %1942 = vmatpush2.bf16.msra.mxu1 %v2910_v63  ;;  %1902 = vmatprep.subr.bf16.mxu0 %v2915_v0  ;;  %v2028_v63 = vld [vmem:[#allocation8 + $0x148] sm:$0xff] }
 0x112   :  { %1943 = vmatprep.subr.bf16.mxu1 %v2918_v1  ;;  %v1992_v0 = vld [vmem:[#allocation8 + $0x28] sm:$0xff]  ;;  %v2043_v1 = vld [vmem:[#allocation8 + $0x1c0] sm:$0xff] }
 0x114   :  { %1903 = vmatpush2.bf16.msra.mxu0 %v2913_v2  ;;  %v2007_v2 = vld [vmem:[#allocation8 + $0xa0] sm:$0xff] }
 0x115   :  { %1944 = vmatpush2.bf16.msra.mxu1 %v2916_v3  ;;  %1904 = vmatprep.subr.bf16.mxu0 %v2921_v4  ;;  %v2027_v3 = vld [vmem:[#allocation8 + $0x140] sm:$0xff] }
 0x116   :  { %1945 = vmatprep.subr.bf16.mxu1 %v2924_v5  ;;  %v1991_v4 = vld [vmem:[#allocation8 + $0x20] sm:$0xff]  ;;  %v2042_v5 = vld [vmem:[#allocation8 + $0x1b8] sm:$0xff] }
 0x118   :  { %1905 = vmatpush2.bf16.msra.mxu0 %v2919_v8  ;;  %v2006_v8 = vld [vmem:[#allocation8 + $0x98] sm:$0xff] }
 0x119   :  { %1946 = vmatpush2.bf16.msra.mxu1 %v2922_v9  ;;  %1906 = vmatprep.subr.bf16.mxu0 %v2927_v10  ;;  %v2026_v9 = vld [vmem:[#allocation8 + $0x138] sm:$0xff] }
 0x11a   :  { %1947 = vmatprep.subr.bf16.mxu1 %v2930_v11  ;;  %v1990_v10 = vld [vmem:[#allocation8 + $0x18] sm:$0xff]  ;;  %v2041_v11 = vld [vmem:[#allocation8 + $0x1b0] sm:$0xff] }
 0x11c   :  { %1907 = vmatpush2.bf16.msra.mxu0 %v2925_v12  ;;  %v2005_v12 = vld [vmem:[#allocation8 + $0x90] sm:$0xff] }
 0x11d   :  { %1948 = vmatpush2.bf16.msra.mxu1 %v2928_v13  ;;  %1908 = vmatprep.subr.bf16.mxu0 %v2933_v14  ;;  %v2025_v13 = vld [vmem:[#allocation8 + $0x130] sm:$0xff] }
 0x11e   :  { %1949 = vmatprep.subr.bf16.mxu1 %v2936_v15  ;;  %v1989_v14 = vld [vmem:[#allocation8 + $0x10] sm:$0xff]  ;;  %v2040_v15 = vld [vmem:[#allocation8 + $0x1a8] sm:$0xff] }
 0x120   :  { %1909 = vmatpush2.bf16.msra.mxu0 %v2931_v18  ;;  %v2004_v18 = vld [vmem:[#allocation8 + $0x88] sm:$0xff] }
 0x121   :  { %1950 = vmatpush2.bf16.msra.mxu1 %v2934_v19  ;;  %1910 = vmatprep.subr.bf16.mxu0 %v2939_v20  ;;  %v2024_v19 = vld [vmem:[#allocation8 + $0x128] sm:$0xff] }
 0x122   :  { %1951 = vmatprep.subr.bf16.mxu1 %v2942_v21  ;;  %v1988_v20 = vld [vmem:[#allocation8 + $0x8] sm:$0xff]  ;;  %v2039_v21 = vld [vmem:[#allocation8 + $0x1a0] sm:$0xff] }
 0x124   :  { %1911 = vmatpush2.bf16.msra.mxu0 %v2937_v22  ;;  %v2003_v22 = vld [vmem:[#allocation8 + $0x80] sm:$0xff] }
 0x125   :  { %1952 = vmatpush2.bf16.msra.mxu1 %v2940_v23  ;;  %2473 = vmatprep.subr.mxu0 %v2018_v24  ;;  %v2023_v23 = vld [vmem:[#allocation8 + $0x120] sm:$0xff] }
 0x126   :  { %2508 = vmatprep.subr.mxu1 %v2050_v37  ;;  %v1987_v24 = vld [vmem:[#allocation8] sm:$0xff]  ;;  %v2020_v37 = vld [vmem:[#allocation8 + $0x108] sm:$0xff] }
 0x127   :  { %v1668_v27 = vpop.f32.mrf.mxu0  ;;  %1913 = vmatmul.mubr.bf16.vlgmr.msra.gmra.mxu0 %v3096_v16  ;;  %v2014_v16 = vld [vmem:[#allocation8 + $0xd8] sm:$0xff] }
 0x128   :  { %v1709_v28 = vpop.f32.mrf.mxu1  ;;  %1954 = vmatmul.mubr.bf16.vlgmr.msra.gmra.mxu1 %v3100_v17  ;;  %2474 = vmatpush3.msra.mxu0 %v2002_v25  ;;  %v1998_v17 = vld [vmem:[#allocation8 + $0x58] sm:$0xff] }
 0x129   :  { %v3112_v30 = vadd.f32 %v1709_v28, %v1668_v27  ;;  %v3114_v32 = vpop.f32.mrf.mxu0  ;;  %2475 = vmatprep.subr.mxu0 %v2017_v26  ;;  %2509 = vmatpush3.msra.mxu1 %v2034_v38  ;;  %v2038_v25 = vld [vmem:[#allocation8 + $0x198] sm:$0xff] }
 0x12a   :  { %v3116_v33 = vpop.f32.mrf.mxu1  ;;  %2476 = vmatpush3.msra.mxu0 %v2001_v29  ;;  %2510 = vmatprep.subr.mxu1 %v2049_v39  ;;  %v2022_v28 = vld [vmem:[#allocation8 + $0x118] sm:$0xff]  ;;  %v2035_v39 = vld [vmem:[#allocation8 + $0x180] sm:$0xff] }
 0x12b   :  { %v1672_v34 = vpop.f32.mrf.mxu0  ;;  %2477 = vmatprep.subr.mxu0 %v2016_v31  ;;  %2511 = vmatpush3.msra.mxu1 %v2033_v41  ;;  %v1712_v29 = vadd.f32 %v3116_v33, %v3114_v32 }
 0x12c   :  { %v1713_v47 = vpop.f32.mrf.mxu1  ;;  %2478 = vmatpush3.msra.mxu0 %v2000_v6  ;;  %2512 = vmatprep.subr.mxu1 %v2048_v43  ;;  %v2037_v6 = vld [vmem:[#allocation8 + $0x190] sm:$0xff] }
 0x12d   :  { %v1673_v35 = vpop.f32.mrf.mxu0  ;;  %2479 = vmatprep.subr.mxu0 %v2015_v7  ;;  %2513 = vmatpush3.msra.mxu1 %v2032_v45  ;;  %v2021_v47 = vld [vmem:[#allocation8 + $0x110] sm:$0xff] }
 0x12e   :  { %v1714_v36 = vpop.f32.mrf.mxu1  ;;  %2480 = vmatpush3.msra.mxu0 %v1999_v51  ;;  %2514 = vmatprep.subr.mxu1 %v2047_v48 }
 0x12f   :  { %2481 = vmatprep.subr.mxu0 %v2014_v16  ;;  %2515 = vmatpush3.msra.mxu1 %v2031_v50 }
 0x130   :  { %2482 = vmatpush3.msra.mxu0 %v1998_v17  ;;  %2516 = vmatprep.subr.mxu1 %v2046_v53  ;;  %v2036_v17 = vld [vmem:[#allocation8 + $0x188] sm:$0xff] }
 0x131   :  { %2483 = vmatprep.subr.mxu0 %v2013_v40  ;;  %2517 = vmatpush3.msra.mxu1 %v2030_v55 }
 0x132   :  { %2484 = vmatpush3.msra.mxu0 %v1997_v42  ;;  %2518 = vmatprep.subr.mxu1 %v2045_v57 }
 0x133   :  { %2485 = vmatprep.subr.mxu0 %v2012_v44  ;;  %2519 = vmatpush3.msra.mxu1 %v2029_v59 }
 0x134   :  { %2486 = vmatpush3.msra.mxu0 %v1996_v46  ;;  %2520 = vmatprep.subr.mxu1 %v2044_v61 }
 0x135   :  { %2487 = vmatprep.subr.mxu0 %v2011_v49  ;;  %2521 = vmatpush3.msra.mxu1 %v2028_v63 }
 0x136   :  { %2488 = vmatpush3.msra.mxu0 %v1995_v52  ;;  %2522 = vmatprep.subr.mxu1 %v2043_v1 }
 0x137   :  { %2489 = vmatprep.subr.mxu0 %v2010_v54  ;;  %2523 = vmatpush3.msra.mxu1 %v2027_v3 }
 0x138   :  { %2490 = vmatpush3.msra.mxu0 %v1994_v56  ;;  %2524 = vmatprep.subr.mxu1 %v2042_v5 }
 0x139   :  { %2491 = vmatprep.subr.mxu0 %v2009_v58  ;;  %2525 = vmatpush3.msra.mxu1 %v2026_v9 }
 0x13a   :  { %2492 = vmatpush3.msra.mxu0 %v1993_v60  ;;  %2526 = vmatprep.subr.mxu1 %v2041_v11 }
 0x13b   :  { %2493 = vmatprep.subr.mxu0 %v2008_v62  ;;  %2527 = vmatpush3.msra.mxu1 %v2025_v13 }
 0x13c   :  { %2494 = vmatpush3.msra.mxu0 %v1992_v0  ;;  %2528 = vmatprep.subr.mxu1 %v2040_v15 }
 0x13d   :  { %2495 = vmatprep.subr.mxu0 %v2007_v2  ;;  %2529 = vmatpush3.msra.mxu1 %v2024_v19 }
 0x13e   :  { %2496 = vmatpush3.msra.mxu0 %v1991_v4  ;;  %2530 = vmatprep.subr.mxu1 %v2039_v21 }
 0x13f   :  { %2497 = vmatprep.subr.mxu0 %v2006_v8  ;;  %2531 = vmatpush3.msra.mxu1 %v2023_v23 }
 0x140   :  { %2498 = vmatpush3.msra.mxu0 %v1990_v10  ;;  %2532 = vmatprep.subr.mxu1 %v2038_v25 }
 0x141   :  { %2499 = vmatprep.subr.mxu0 %v2005_v12  ;;  %2533 = vmatpush3.msra.mxu1 %v2022_v28 }
 0x142   :  { %2500 = vmatpush3.msra.mxu0 %v1989_v14  ;;  %2534 = vmatprep.subr.mxu1 %v2037_v6 }
 0x143   :  { %2501 = vmatprep.subr.mxu0 %v2004_v18  ;;  %2535 = vmatpush3.msra.mxu1 %v2021_v47 }
 0x144   :  { %2502 = vmatpush3.msra.mxu0 %v1988_v20  ;;  %2536 = vmatprep.subr.mxu1 %v2036_v17 }
 0x145   :  { %2503 = vmatprep.subr.mxu0 %v2003_v22  ;;  %2537 = vmatpush3.msra.mxu1 %v2020_v37 }
 0x146   :  { %2504 = vmatpush3.msra.mxu0 %v1987_v24  ;;  %2538 = vmatprep.subr.mxu1 %v2035_v39 }
 0x167   :  { %v1750_v26 = vpop.f32.mrf.mxu0 }
 0x168   :  { %v1791_v27 = vpop.f32.mrf.mxu1  ;;  %v1751_v31 = vadd.f32 %v1750_v26, %v3112_v30  ;;  %v2019_v30 = vld [vmem:[#allocation8 + $0x100] sm:$0xff] }
 0x169   :  { %v1752_v7 = vpop.f32.mrf.mxu0  ;;  %2539 = vmatpush3.msra.mxu1 %v2019_v30 }
 0x16a   :  { %v1793_v34 = vpop.f32.mrf.mxu1  ;;  %v1792_v51 = vadd.f32 %v1791_v27, %v1751_v31  ;;  %v1753_v16 = vadd.f32 %v1752_v7, %v1712_v29 }
 0x16b   :  { %v1754_v35 = vpop.f32.mrf.mxu0 }
 0x16c   :  { %v1795_v36 = vpop.f32.mrf.mxu1  ;;  %v1794_v38 = vadd.f32 %v1793_v34, %v1753_v16  ;;  %v1977_v40 = vmul.f32 %v1792_v51, %v1792_v51 }
 0x16d   :  { %v1755_v32 = vpop.f32.mrf.mxu0 }
 0x16e   :  { %v1796_v33 = vpop.f32.mrf.mxu1  ;;  %v1978_v41 = vmul.f32 %v1794_v38, %v1794_v38  ;;  %2115 = vmatprep.mubr.f32.mxu0 %v1794_v38 }
 0x16f   :  { %2116 = vmatmul.mubr.f32.vlgmr.msra.gmra.mxu0 %v1792_v51 }
 0x170   :  { %v1981_v42 = vadd.f32 %v1978_v41, %v1977_v40 }
 0x1a7   :  { %v1832_v43 = vpop.f32.mrf.mxu0 }
 0x1a8   :  { %v1873_v44 = vpop.f32.mrf.mxu1 }
 0x1a9   :  { %v1834_v45 = vpop.f32.mrf.mxu0  ;;  %v1874_v53 = vadd.f32 %v1873_v44, %v1832_v43 }
 0x1aa   :  { %v1875_v46 = vpop.f32.mrf.mxu1 }
 0x1ab   :  { %v1836_v48 = vpop.f32.mrf.mxu0  ;;  %v1876_v56 = vadd.f32 %v1875_v46, %v1834_v45 }
 0x1ac   :  { %v1877_v49 = vpop.f32.mrf.mxu1 }
 0x1ad   :  { %v1837_v50 = vpop.f32.mrf.mxu0 }
 0x1ae   :  { %v1878_v52 = vpop.f32.mrf.mxu1 }
 0x1e7   :  { %v1914_v54 = vpop.f32.mrf.mxu0 }
 0x1e8   :  { %v1955_v55 = vpop.f32.mrf.mxu1  ;;  %v1915_v57 = vadd.f32 %v1914_v54, %v1874_v53 }
 0x1e9   :  { %v1916_v58 = vpop.f32.mrf.mxu0 }
 0x1ea   :  { %v1957_v59 = vpop.f32.mrf.mxu1  ;;  %v1956_v60 = vadd.f32 %v1955_v55, %v1915_v57  ;;  %v1917_v61 = vadd.f32 %v1916_v58, %v1876_v56 }
 0x1eb   :  { %v1918_v62 = vpop.f32.mrf.mxu0 }
 0x1ec   :  { %v1959_v63 = vpop.f32.mrf.mxu1  ;;  %v1979_v0 = vmul.f32 %v1956_v60, %v1956_v60  ;;  %v1958_v1 = vadd.f32 %v1957_v59, %v1917_v61 }
 0x1ed   :  { %v1919_v2 = vpop.f32.mrf.mxu0 }
 0x1ee   :  { %v1960_v3 = vpop.f32.mrf.mxu1  ;;  %2185 = vmatprep.mubr.f32.mxu1 %v1958_v1  ;;  %v1980_v4 = vmul.f32 %v1958_v1, %v1958_v1  ;;  %v1982_v5 = vadd.f32 %v1981_v42, %v1979_v0 }
 0x1ef   :  { %2186 = vmatmul.mubr.f32.vlgmr.msra.gmra.mxu1 %v1956_v60 }
 0x1f0   :  { %v1983_v8 = vadd.f32 %v1982_v5, %v1980_v4 }
 0x1f2   :  { %1984 = vadd.xlane.f32.xlu0 %v1983_v8 }
 0x22f   :  { %v2505_v10 = vpop.f32.mrf.mxu0 }
 0x231   :  { %v2506_v11 = vpop.f32.mrf.mxu0 }
 0x232   :  { %v2507_v14 = vadd.f32 %v2506_v11, %v2505_v10 }
 0x27b   :  { %v1985_v9 = vpop.xlane.xlu0 %1984 }
 0x27c   :  { %2943 = vrsqrt.f32 %v1985_v9 }
 0x289   :  { %v2944_v19 = vpop.eup %2943 }
 0x2af   :  { %v2540_v12 = vpop.f32.mrf.mxu1 }
 0x2b1   :  { %v2541_v13 = vpop.f32.mrf.mxu1 }
 0x2b2   :  { %v2542_v15 = vadd.f32 %v2541_v13, %v2540_v12 }
 0x2b4   :  { %v2188_v18 = vadd.f32 %v2542_v15, %v2507_v14 }
 0x2b6   :  { %v2191_v20 = vmul.f32 %v2944_v19, %v2188_v18 }
 0x2b8   :  { %2192 = vst [vmem:[#allocation9] sm:$0xff] %v2191_v20 }
 0x2b9   :  { %3016 = shalt.err (!%p3013_p5)
}
 0x2ba   :  { %2202 = dma.vmem_to_hbm [thread:$0]  %s2200_s2, 128, %s3127_s3, [#allocation5]  }
 0x2bb   :  { %3029 = dma.done.wait [#allocation5], 128  }
 0x2bc   :  { %3030 = vsyncadd [#allocation5], 4294967168 }
 0x2bd   :  { %2206 = vsyncpa [#allocation4], 1 }
 0x2be   :  { %2207 = vsyncpa [#allocation7], 1 }
 0x2bf   :  { %2208 = vsyncpa [#allocation5], 1 }

</bundles_post_ra>
